<compile_context>
chip_gen: v7x
topology: tpu7x:2x2x1
jax: 0.10.0
libtpu: 0.0.40
codegen_flags: <defaults>
</compile_context>

<pallas_src>
import functools
import math

import jax
import jax.numpy as jnp
from jax.experimental import pallas as pl
from jax.experimental.pallas import tpu as pltpu

EPS = 1e-07
_MAX_TK = 2048  # lanes per negative tile; bsz*2048*4B*2 buffers stays well inside scoped VMEM


def _contrast_loss_kernel(x_pos_ref, x_neg_ref, out_ref,
                          acc_logd_ref, acc_cnt_ref, *,
                          m, bsz, tk, shift, thr_neg, neg_log_const, mask_last):
    k = pl.program_id(0)
    nk = pl.num_programs(0)

    @pl.when(k == 0)
    def _init():
        acc_logd_ref[...] = jnp.zeros_like(acc_logd_ref)  # sum log(x_neg + shift)
        acc_cnt_ref[...] = jnp.zeros_like(acc_cnt_ref)    # count (D0 > 0.5)

    # ---- hot path: lane-dense (bsz, tk) negative tile -----------------------
    x_neg = x_neg_ref[...]

    if mask_last:
        # Last tile may be ragged.  Replace out-of-range lanes with a fill
        # value whose log-term is exactly 0 and which never counts as a hit:
        #   log(fill + shift) = log(1) = 0,   fill = 1 - shift > thr_neg.
        # (Static no-op when m % tk == 0, so the common path pays nothing.)
        col = k * tk + jax.lax.broadcasted_iota(jnp.int32, x_neg.shape, 1)
        x_neg = jnp.where(col < m, x_neg, jnp.float32(1.0 - shift))

    log_denom = jnp.log(x_neg + jnp.float32(shift))              # one EUP log / elem
    hit = jnp.where(x_neg < jnp.float32(thr_neg),
                    jnp.float32(1.0), jnp.float32(0.0))          # VPU filler

    acc_logd_ref[...] += jnp.sum(log_denom, keepdims=True)
    acc_cnt_ref[...] += jnp.sum(hit, keepdims=True)

    # ---- finalize: tiny positive-column work + scalar outputs ---------------
    @pl.when(k == nk - 1)
    def _finalize():
        x_pos = x_pos_ref[...]                                   # (bsz, 1)
        sum_log_pos = jnp.sum(jnp.log(x_pos), keepdims=True)
        sum_log_pos_den = jnp.sum(jnp.log(x_pos + jnp.float32(shift)),
                                  keepdims=True)
        pos_hits = jnp.sum(jnp.where(x_pos > jnp.float32(shift),
                                     jnp.float32(1.0), jnp.float32(0.0)),
                           keepdims=True)

        sum_log_d1 = sum_log_pos - sum_log_pos_den               # (1,1)
        sum_log_d0 = jnp.float32(neg_log_const) - acc_logd_ref[...]
        loss = -(sum_log_d1 + sum_log_d0) * jnp.float32(1.0 / bsz)

        cnt_neg = acc_cnt_ref[...]
        out_ref[0] = loss[0, 0]                                    # loss
        out_ref[1] = cnt_neg[0, 0] * jnp.float32(1.0 / (bsz * m))  # acc_D0
        out_ref[2] = pos_hits[0, 0] * jnp.float32(1.0 / bsz)       # acc_D1


def contrast_loss(x, n_data, *, max_tk=_MAX_TK):
    """Pallas implementation of ContrastLoss.forward.

    Returns (loss, acc_D0, acc_D1); loss has shape (1,) as in the torch code,
    the accuracies are scalars (kept on device instead of .cpu().numpy()).
    """
    x = x.astype(jnp.float32)
    bsz, k_plus_1 = x.shape
    m = k_plus_1 - 1
    pn = 1.0 / float(n_data)

    # Compile-time constants for the algebraic rewrite.
    shift = m * pn + EPS                      # m*Pn + eps
    thr_neg = m * pn - EPS                    # D0 > 0.5  <=>  x_neg < thr_neg
    neg_log_const = float(bsz * m) * math.log(m * pn)

    # Split so the dominant block is lane-dense.
    x_pos = x[:, :1]                          # (bsz, 1)
    x_neg = x[:, 1:]                          # (bsz, m)

    # Tile the K axis: full block if small, otherwise max_tk-lane tiles
    # (multiple of 128; double-buffered by the BlockSpec pipeline).
    tk = m if m <= max_tk else max_tk
    nk = pl.cdiv(m, tk)
    mask_last = (m % tk) != 0

    kernel = functools.partial(
        _contrast_loss_kernel,
        m=m, bsz=bsz, tk=tk, shift=shift, thr_neg=thr_neg,
        neg_log_const=neg_log_const, mask_last=mask_last)

    out = pl.pallas_call(
        kernel,
        out_shape=jax.ShapeDtypeStruct((3,), jnp.float32),
        grid_spec=pltpu.PrefetchScalarGridSpec(
            num_scalar_prefetch=0,
            grid=(nk,),
            in_specs=[
                pl.BlockSpec((bsz, 1), lambda k: (0, 0)),    # positive column (resident)
                pl.BlockSpec((bsz, tk), lambda k: (0, k)),   # negative tiles (pipelined)
            ],
            out_specs=pl.BlockSpec(memory_space=pltpu.MemorySpace.SMEM),
            scratch_shapes=[
                pltpu.VMEM((1, 1), jnp.float32),   # running sum log(x_neg + shift)
                pltpu.VMEM((1, 1), jnp.float32),   # running count (D0 > 0.5)
            ],
        ),
        compiler_params=pltpu.CompilerParams(
            dimension_semantics=("arbitrary",)),
        cost_estimate=pl.CostEstimate(
            flops=4 * bsz * (m + 1),
            transcendentals=bsz * (m + 2),
            bytes_accessed=bsz * (m + 1) * 4 + 12),
    )(x_pos, x_neg)

    loss = out[0:1]            # shape (1,) like the torch module
    acc_d0 = out[1]
    acc_d1 = out[2]
    return loss, acc_d0, acc_d1


def _reference(x, n_data):
    # Plain-JAX reference mirroring the torch code, for verification only.
    x = x.astype(jnp.float32)
    bsz, k = x.shape
    m = k - 1
    pn = 1.0 / float(n_data)
    p_pos = x[:, 0]
    d1 = p_pos / (p_pos + (m * pn + EPS))
    acc_d1 = jnp.mean((d1 > 0.5).astype(jnp.float32))
    p_neg = x[:, 1:]
    d0 = (m * pn) / (p_neg + (m * pn + EPS))
    acc_d0 = jnp.mean((d0 > 0.5).astype(jnp.float32))
    loss = -(jnp.sum(jnp.log(d1)) + jnp.sum(jnp.log(d0))) / bsz
    return loss.reshape((1,)), acc_d0, acc_d1


if __name__ == "__main__":
    key = jax.random.PRNGKey(0)

    # Small case (single-tile path): 8 samples, 1 positive + 16 negatives.
    bsz, n_neg, n_data = 8, 16, 128
    x_small = jax.random.uniform(
        key, (bsz, n_neg + 1), dtype=jnp.float32, minval=1e-4, maxval=1.0)

    loss, acc_d0, acc_d1 = contrast_loss(x_small, n_data)
    jax.block_until_ready((loss, acc_d0, acc_d1))
    r_loss, r_d0, r_d1 = _reference(x_small, n_data)
    assert jnp.allclose(loss, r_loss, rtol=1e-5, atol=1e-5), (loss, r_loss)
    assert jnp.allclose(acc_d0, r_d0, rtol=1e-6, atol=1e-6)
    assert jnp.allclose(acc_d1, r_d1, rtol=1e-6, atol=1e-6)

    # Small-ish case exercising the tiled K-grid + ragged-last-tile mask path
    # (tile forced to 512 lanes -> 4 tiles, last one ragged).
    key2 = jax.random.PRNGKey(0)
    bsz2, n_neg2, n_data2 = 8, 3 * 512 + 100, 50000
    x_big = jax.random.uniform(
        key2, (bsz2, n_neg2 + 1), dtype=jnp.float32, minval=1e-4, maxval=1.0)

    loss2, acc2_d0, acc2_d1 = contrast_loss(x_big, n_data2, max_tk=512)
    jax.block_until_ready((loss2, acc2_d0, acc2_d1))
    r_loss2, r2_d0, r2_d1 = _reference(x_big, n_data2)
    assert jnp.allclose(loss2, r_loss2, rtol=1e-4, atol=1e-2), (loss2, r_loss2)
    assert jnp.allclose(acc2_d0, r2_d0, rtol=1e-4, atol=1e-4)
    assert jnp.allclose(acc2_d1, r2_d1, rtol=1e-4, atol=1e-4)

    print("KERNEL_OK")
</pallas_src>

<mosaic_0001>
module attributes {stable_mosaic.version = 11 : i64} {
  func.func @_contrast_loss_kernel(%arg0: i32, %arg1: memref<8x1xf32, #tpu.memory_space<vmem>>, %arg2: memref<8x16xf32, #tpu.memory_space<vmem>>, %arg3: memref<3xf32, #tpu.memory_space<smem>>, %arg4: memref<1x1xf32, #tpu.memory_space<vmem>>, %arg5: memref<1x1xf32, #tpu.memory_space<vmem>>) attributes {dimension_semantics = [#tpu.dimension_semantics<arbitrary>], iteration_bounds = array<i64: 1>, scalar_prefetch = 0 : i64, scratch_operands = 2 : i64, tpu.core_type = #tpu.core_type<tc>, window_params = [{pipeline_mode = #tpu.pipeline_mode<synchronous>, transform_indices = @transform_0, window_bounds = array<i64: 8, 1>}, {transform_indices = @transform_1, window_bounds = array<i64: 8, 16>}, {transform_indices = @transform_2, window_bounds = array<i64: 3>}]} {
    %c0_i32 = arith.constant 0 : i32
    %0 = arith.cmpi eq, %arg0, %c0_i32 : i32
    %1 = arith.extui %0 : i1 to i32
    %c0_i32_0 = arith.constant 0 : i32
    %2 = arith.cmpi ne, %1, %c0_i32_0 : i32
    scf.if %2 {
      %cst_17 = arith.constant 0.000000e+00 : f32
      %31 = vector.broadcast %cst_17 : f32 to vector<1x1xf32>
      %c0_18 = arith.constant 0 : index
      %c0_19 = arith.constant 0 : index
      %32 = vector.load %arg4[%c0_18, %c0_19] : memref<1x1xf32, #tpu.memory_space<vmem>>, vector<1x1xf32>
      tpu.vector_store %arg4[%c0_18, %c0_19], %31 {strides = array<i32>} : memref<1x1xf32, #tpu.memory_space<vmem>>, vector<1x1xf32>,
      %cst_20 = arith.constant 0.000000e+00 : f32
      %33 = vector.broadcast %cst_20 : f32 to vector<1x1xf32>
      %c0_21 = arith.constant 0 : index
      %c0_22 = arith.constant 0 : index
      %34 = vector.load %arg5[%c0_21, %c0_22] : memref<1x1xf32, #tpu.memory_space<vmem>>, vector<1x1xf32>
      tpu.vector_store %arg5[%c0_21, %c0_22], %33 {strides = array<i32>} : memref<1x1xf32, #tpu.memory_space<vmem>>, vector<1x1xf32>,
    } else {
    }
    %c0 = arith.constant 0 : index
    %c0_1 = arith.constant 0 : index
    %3 = vector.load %arg2[%c0, %c0_1] : memref<8x16xf32, #tpu.memory_space<vmem>>, vector<8x16xf32>
    %cst = arith.constant 0.125000104 : f32
    %4 = vector.broadcast %cst : f32 to vector<8x16xf32>
    %5 = arith.addf %3, %4 : vector<8x16xf32>
    %6 = math.log %5 : vector<8x16xf32>
    %cst_2 = arith.constant 0.124999903 : f32
    %7 = vector.broadcast %cst_2 : f32 to vector<8x16xf32>
    %8 = arith.cmpf olt, %3, %7 : vector<8x16xf32>
    %cst_3 = arith.constant 1.000000e+00 : f32
    %cst_4 = arith.constant 0.000000e+00 : f32
    %9 = vector.broadcast %cst_3 : f32 to vector<8x16xf32>
    %10 = vector.broadcast %cst_4 : f32 to vector<8x16xf32>
    %11 = arith.select %8, %9, %10 : vector<8x16xi1>, vector<8x16xf32>
    %c0_5 = arith.constant 0 : index
    %c0_6 = arith.constant 0 : index
    %12 = vector.load %arg4[%c0_5, %c0_6] : memref<1x1xf32, #tpu.memory_space<vmem>>, vector<1x1xf32>
    %13 = vector.shape_cast %6 : vector<8x16xf32> to vector<1x8x16xf32>
    %cst_7 = arith.constant dense<0.000000e+00> : vector<1xf32>
    %14 = vector.multi_reduction <add>, %13, %cst_7 [1, 2] : vector<1x8x16xf32> to vector<1xf32>
    %15 = vector.shape_cast %14 : vector<1xf32> to vector<1x1x1xf32>
    %16 = vector.extract %15[0, 0, 0] : f32 from vector<1x1x1xf32>
    %17 = vector.broadcast %16 : f32 to vector<1x1xf32>
    %18 = arith.addf %12, %17 : vector<1x1xf32>
    %c0_8 = arith.constant 0 : index
    %c0_9 = arith.constant 0 : index
    %19 = vector.load %arg4[%c0_8, %c0_9] : memref<1x1xf32, #tpu.memory_space<vmem>>, vector<1x1xf32>
    tpu.vector_store %arg4[%c0_8, %c0_9], %18 {strides = array<i32>} : memref<1x1xf32, #tpu.memory_space<vmem>>, vector<1x1xf32>,
    %c0_10 = arith.constant 0 : index
    %c0_11 = arith.constant 0 : index
    %20 = vector.load %arg5[%c0_10, %c0_11] : memref<1x1xf32, #tpu.memory_space<vmem>>, vector<1x1xf32>
    %21 = vector.shape_cast %11 : vector<8x16xf32> to vector<1x8x16xf32>
    %cst_12 = arith.constant dense<0.000000e+00> : vector<1xf32>
    %22 = vector.multi_reduction <add>, %21, %cst_12 [1, 2] : vector<1x8x16xf32> to vector<1xf32>
    %23 = vector.shape_cast %22 : vector<1xf32> to vector<1x1x1xf32>
    %24 = vector.extract %23[0, 0, 0] : f32 from vector<1x1x1xf32>
    %25 = vector.broadcast %24 : f32 to vector<1x1xf32>
    %26 = arith.addf %20, %25 : vector<1x1xf32>
    %c0_13 = arith.constant 0 : index
    %c0_14 = arith.constant 0 : index
    %27 = vector.load %arg5[%c0_13, %c0_14] : memref<1x1xf32, #tpu.memory_space<vmem>>, vector<1x1xf32>
    tpu.vector_store %arg5[%c0_13, %c0_14], %26 {strides = array<i32>} : memref<1x1xf32, #tpu.memory_space<vmem>>, vector<1x1xf32>,
    %c0_i32_15 = arith.constant 0 : i32
    %28 = arith.cmpi eq, %arg0, %c0_i32_15 : i32
    %29 = arith.extui %28 : i1 to i32
    %c0_i32_16 = arith.constant 0 : i32
    %30 = arith.cmpi ne, %29, %c0_i32_16 : i32
    scf.if %30 {
      %c0_17 = arith.constant 0 : index
      %c0_18 = arith.constant 0 : index
      %31 = vector.load %arg1[%c0_17, %c0_18] : memref<8x1xf32, #tpu.memory_space<vmem>>, vector<8x1xf32>
      %32 = math.log %31 : vector<8x1xf32>
      %33 = vector.shape_cast %32 : vector<8x1xf32> to vector<1x8x1xf32>
      %cst_19 = arith.constant dense<0.000000e+00> : vector<1xf32>
      %34 = vector.multi_reduction <add>, %33, %cst_19 [1, 2] : vector<1x8x1xf32> to vector<1xf32>
      %35 = vector.shape_cast %34 : vector<1xf32> to vector<1x1x1xf32>
      %36 = vector.extract %35[0, 0, 0] : f32 from vector<1x1x1xf32>
      %37 = vector.broadcast %36 : f32 to vector<1x1xf32>
      %cst_20 = arith.constant 0.125000104 : f32
      %38 = vector.broadcast %cst_20 : f32 to vector<8x1xf32>
      %39 = arith.addf %31, %38 : vector<8x1xf32>
      %40 = math.log %39 : vector<8x1xf32>
      %41 = vector.shape_cast %40 : vector<8x1xf32> to vector<1x8x1xf32>
      %cst_21 = arith.constant dense<0.000000e+00> : vector<1xf32>
      %42 = vector.multi_reduction <add>, %41, %cst_21 [1, 2] : vector<1x8x1xf32> to vector<1xf32>
      %43 = vector.shape_cast %42 : vector<1xf32> to vector<1x1x1xf32>
      %44 = vector.extract %43[0, 0, 0] : f32 from vector<1x1x1xf32>
      %45 = vector.broadcast %44 : f32 to vector<1x1xf32>
      %cst_22 = arith.constant 0.125000104 : f32
      %46 = vector.broadcast %cst_22 : f32 to vector<8x1xf32>
      %47 = arith.cmpf ogt, %31, %46 : vector<8x1xf32>
      %cst_23 = arith.constant 1.000000e+00 : f32
      %cst_24 = arith.constant 0.000000e+00 : f32
      %48 = vector.broadcast %cst_23 : f32 to vector<8x1xf32>
      %49 = vector.broadcast %cst_24 : f32 to vector<8x1xf32>
      %50 = arith.select %47, %48, %49 : vector<8x1xi1>, vector<8x1xf32>
      %51 = vector.shape_cast %50 : vector<8x1xf32> to vector<1x8x1xf32>
      %cst_25 = arith.constant dense<0.000000e+00> : vector<1xf32>
      %52 = vector.multi_reduction <add>, %51, %cst_25 [1, 2] : vector<1x8x1xf32> to vector<1xf32>
      %53 = vector.shape_cast %52 : vector<1xf32> to vector<1x1x1xf32>
      %54 = vector.extract %53[0, 0, 0] : f32 from vector<1x1x1xf32>
      %55 = vector.broadcast %54 : f32 to vector<1x1xf32>
      %56 = arith.subf %37, %45 : vector<1x1xf32>
      %c0_26 = arith.constant 0 : index
      %c0_27 = arith.constant 0 : index
      %57 = vector.load %arg4[%c0_26, %c0_27] : memref<1x1xf32, #tpu.memory_space<vmem>>, vector<1x1xf32>
      %cst_28 = arith.constant -266.168518 : f32
      %58 = vector.broadcast %cst_28 : f32 to vector<1x1xf32>
      %59 = arith.subf %58, %57 : vector<1x1xf32>
      %60 = arith.addf %56, %59 : vector<1x1xf32>
      %cst_29 = arith.constant 0.000000e+00 : f32
      %61 = vector.broadcast %cst_29 : f32 to vector<1x1xf32>
      %62 = arith.subf %61, %60 : vector<1x1xf32>
      %cst_30 = arith.constant 1.250000e-01 : f32
      %63 = vector.broadcast %cst_30 : f32 to vector<1x1xf32>
      %64 = arith.mulf %62, %63 : vector<1x1xf32>
      %c0_31 = arith.constant 0 : index
      %c0_32 = arith.constant 0 : index
      %65 = vector.load %arg5[%c0_31, %c0_32] : memref<1x1xf32, #tpu.memory_space<vmem>>, vector<1x1xf32>
      %66 = vector.extract %64[0, 0] : f32 from vector<1x1xf32>
      %c0_33 = arith.constant 0 : index
      %67 = memref.load %arg3[%c0_33] : memref<3xf32, #tpu.memory_space<smem>>
      memref.store %66, %arg3[%c0_33] : memref<3xf32, #tpu.memory_space<smem>>
      %68 = vector.extract %65[0, 0] : f32 from vector<1x1xf32>
      %cst_34 = arith.constant 7.812500e-03 : f32
      %69 = arith.mulf %68, %cst_34 : f32
      %c1 = arith.constant 1 : index
      %70 = memref.load %arg3[%c1] : memref<3xf32, #tpu.memory_space<smem>>
      memref.store %69, %arg3[%c1] : memref<3xf32, #tpu.memory_space<smem>>
      %71 = vector.extract %55[0, 0] : f32 from vector<1x1xf32>
      %cst_35 = arith.constant 1.250000e-01 : f32
      %72 = arith.mulf %71, %cst_35 : f32
      %c2 = arith.constant 2 : index
      %73 = memref.load %arg3[%c2] : memref<3xf32, #tpu.memory_space<smem>>
      memref.store %72, %arg3[%c2] : memref<3xf32, #tpu.memory_space<smem>>
    } else {
    }
    return
  }
  func.func @transform_0(%arg0: i32) -> (i32, i32) {
    %c0_i32 = arith.constant 0 : i32
    %c0_i32_0 = arith.constant 0 : i32
    %c0_i32_1 = arith.constant 0 : i32
    return %c0_i32, %c0_i32_0 : i32, i32
  }
  func.func @transform_1(%arg0: i32) -> (i32, i32) {
    %c0_i32 = arith.constant 0 : i32
    %c0_i32_0 = arith.constant 0 : i32
    return %c0_i32, %arg0 : i32, i32
  }
  func.func @transform_2(%arg0: i32) -> i32 {
    %c0_i32 = arith.constant 0 : i32
    %c0_i32_0 = arith.constant 0 : i32
    return %c0_i32 : i32
  }
}

</mosaic_0001>

<bundles_post_ra>
// kernel: tpu_custom_call.1
= control target key start
LH: loop header
LB: loop body
LE: loop exit
PB: predicated region body
PF: predicated region fallthrough
CT: control target
= control target key end

     0   :  { %vm16_vm0 = vcmask 0   ;;  %v163_v4 = vmov 0.0   ;;  %s205_s0 = inlined_call_operand.vmem [shape: f32[8,1], index: 0, kind: input, shape index: {}]   ;;  %s206_s1 = inlined_call_operand.vmem [shape: f32[8,16], index: 1, kind: input, shape index: {}]   ;;  %s207_s2 = inlined_call_operand.hbm [shape: f32[3], index: 2, kind: output, shape index: {}]  }
   0x1   :  { %v58_v0 = vld [vmem:[%s205_s0] sm:$0xff]  ;;  %17 = vst.msk [vmem:[#allocation2] sm:$0x1] %vm16_vm0, %v163_v4  ;;  %18 = vst.msk [vmem:[#allocation3] sm:$0x1] %vm16_vm0, %v163_v4 }
   0x2   :  { %v19_v1 = vld [vmem:[%s206_s1] sm:$0xff]  ;;  %145 = vlog2.f32 %v58_v0  ;;  %v73_v3 = vadd.f32 0.1250001, %v58_v0 }
   0x3   :  { %v20_v2 = vadd.f32 0.1250001, %v19_v1 }
   0x4   :  { %7 = vsyncpa [#allocation5], 0  ;;  %vm61_vm1 = vcmask 7168   ;;  %vm23_vm2 = vcmp.lt.f32.partialorder %v19_v1, 0.1249999  ;;  %vm26_vm3 = vcmask 130048  }
   0x5   :  { %147 = vlog2.f32 %v20_v2  ;;  %v24_v12 = vsel %vm23_vm2, 1.0, %v163_v4  ;;  %vm87_vm4 = vcmp.gt.f32.partialorder %v58_v0, 0.1250001  ;;  %s151_s22 = scalar_lea.hbm %s207_s2, 16 }
   0x6   :  { %149 = vlog2.f32 %v73_v3  ;;  %v42_v15 = vsel %vm26_vm3, %v24_v12, 0.0  ;;  %v88_v16 = vsel %vm87_vm4, 1.0, %v163_v4  ;;  %p152_p0 = scmp.ne.s32.totalorder %s207_s2, %s151_s22  ;;  %p155_p1 = scmp.lt.u32.totalorder %s151_s22, %s207_s2 }
   0x7   :  { %v89_v17 = vsel %vm61_vm1, %v88_v16, 0.0 }
   0x8   :  { %v25_v53 = vld [vmem:[#allocation2] sm:$0x1]  ;;  %v41_v56 = vld [vmem:[#allocation3] sm:$0x1]  ;;  %p157_p2 = pnand %p155_p1, %p152_p0 }
   0xc   :  { %v146_v5 = vpop.eup %145 }
   0xd   :  { %v60_v6 = vmul.f32 0.6931472, %v146_v5 }
   0xf   :  { %v148_v7 = vpop.eup %147  ;;  %v62_v9 = vsel %vm61_vm1, %v60_v6, 0.0 }
  0x10   :  { %v150_v8 = vpop.eup %149  ;;  %v22_v10 = vmul.f32 0.6931472, %v148_v7  ;;  %63 = vadd.xlane.f32.xlu1 %v62_v9 }
  0x11   :  { %v75_v11 = vmul.f32 0.6931472, %v150_v8 }
  0x12   :  { %v27_v13 = vsel %vm26_vm3, %v22_v10, 0.0 }
  0x13   :  { %28 = vadd.xlane.f32.xlu0 %v27_v13  ;;  %v76_v14 = vsel %vm61_vm1, %v75_v11, 0.0 }
  0x14   :  { %77 = vadd.xlane.f32.xlu1 %v76_v14 }
  0x17   :  { %43 = vadd.xlane.f32.xlu0 %v42_v15 }
  0x1b   :  { %90 = vadd.xlane.f32.xlu0 %v89_v17 }
  0x9d   :  { %v64_v18 = vpop.xlane.xlu1 %63 }
  0x9e   :  { %v65_v19 = vrot.slane %v64_v18, 4 }
  0xa0   :  { %v29_v20 = vpop.xlane.xlu0 %28  ;;  %v66_v21 = vadd.f32 %v65_v19, %v64_v18 }
  0xa1   :  { %v30_v22 = vrot.slane %v29_v20, 4  ;;  %v78_v23 = vpop.xlane.xlu1 %77 }
  0xa2   :  { %v79_v25 = vrot.slane %v78_v23, 4  ;;  %v67_v26 = vrot.slane %v66_v21, 2 }
  0xa3   :  { %v31_v24 = vadd.f32 %v30_v22, %v29_v20 }
  0xa4   :  { %v44_v27 = vpop.xlane.xlu0 %43  ;;  %v80_v29 = vadd.f32 %v79_v25, %v78_v23  ;;  %v68_v34 = vadd.f32 %v67_v26, %v66_v21 }
  0xa5   :  { %v32_v28 = vrot.slane %v31_v24, 2  ;;  %v45_v30 = vrot.slane %v44_v27, 4 }
  0xa6   :  { %v81_v31 = vrot.slane %v80_v29, 2  ;;  %v69_v43 = vrot.slane %v68_v34, 1 }
  0xa7   :  { %v46_v32 = vadd.f32 %v45_v30, %v44_v27  ;;  %v33_v33 = vadd.f32 %v32_v28, %v31_v24 }
  0xa8   :  { %v91_v35 = vpop.xlane.xlu0 %90  ;;  %v82_v36 = vadd.f32 %v81_v31, %v80_v29  ;;  %v70_v49 = vadd.f32 %v69_v43, %v68_v34 }
  0xa9   :  { %v47_v37 = vrot.slane %v46_v32, 2  ;;  %v34_v38 = vrot.slane %v33_v33, 1  ;;  %v92_v39 = vrot.slane %v91_v35, 4 }
  0xaa   :  { %v83_v42 = vrot.slane %v82_v36, 1 }
  0xab   :  { %v35_v40 = vadd.f32 %v34_v38, %v33_v33  ;;  %v48_v41 = vadd.f32 %v47_v37, %v46_v32  ;;  %v93_v44 = vadd.f32 %v92_v39, %v91_v35 }
  0xac   :  { %v84_v48 = vadd.f32 %v83_v42, %v82_v36 }
  0xad   :  { %129 = vpush %v35_v40  ;;  %v49_v45 = vrot.slane %v48_v41, 1  ;;  %v94_v46 = vrot.slane %v93_v44, 2 }
  0xaf   :  { %v50_v47 = vadd.f32 %v49_v45, %v48_v41  ;;  %v95_v50 = vadd.f32 %v94_v46, %v93_v44 }
  0xb1   :  { %131 = vpush %v50_v47  ;;  %v96_v51 = vrot.slane %v95_v50, 1 }
  0xb2   :  { %133 = vpush %v70_v49 }
  0xb3   :  { %135 = vpush %v84_v48  ;;  %v97_v52 = vadd.f32 %v96_v51, %v95_v50 }
  0xb5   :  { %137 = vpush %v97_v52 }
  0xde   :  { %s130_s0 = spop %129 }
  0xdf   :  { %v37_v54 = vstv %s130_s0 }
  0xe0   :  { %v38_v55 = vadd.f32 %v37_v54, %v25_v53 }
  0xe2   :  { %40 = vst.msk [vmem:[#allocation2] sm:$0x1] %vm16_vm0, %v38_v55  ;;  %s132_s1 = spop %131 }
  0xe3   :  { %v52_v57 = vstv %s132_s1  ;;  %s134_s13 = spop %133 }
  0xe4   :  { %v53_v58 = vadd.f32 %v52_v57, %v41_v56  ;;  %s136_s14 = spop %135  ;;  %v72_v59 = vstv %s134_s13 }
  0xe5   :  { %v86_v60 = vstv %s136_s14 }
  0xe6   :  { %54 = vst.msk [vmem:[#allocation3] sm:$0x1] %vm16_vm0, %v53_v58  ;;  %s138_s15 = spop %137  ;;  %v99_v62 = vsub.f32 %v72_v59, %v86_v60 }
  0xe7   :  { %s113_s16 = smul.f32 0.125, %s138_s15 }
  0xe9   :  { %v100_v61 = vld [vmem:[#allocation2] sm:$0x1]  ;;  %115 = sst [smem:[#allocation4 + $0x2]] %s113_s16 }
  0xea   :  { %v101_v63 = vsub.f32 -266.16852, %v100_v61 }
  0xec   :  { %v102_v0 = vadd.f32 %v101_v63, %v99_v62 }
  0xed   :  { %v105_v3 = vld [vmem:[#allocation3] sm:$0x1] }
  0xee   :  { %v103_v1 = vsub.f32 0.0, %v102_v0 }
  0xf0   :  { %v104_v2 = vmul.f32 0.125, %v103_v1 }
  0xf2   :  { %139 = vpush %v104_v2 }
  0xf3   :  { %141 = vpush %v105_v3 }
 0x123   :  { %s140_s17 = spop %139 }
 0x124   :  { %108 = sst [smem:[#allocation4]] %s140_s17  ;;  %s142_s18 = spop %141 }
 0x125   :  { %s110_s19 = smul.f32 0.0078125, %s142_s18 }
 0x127   :  { %112 = sst [smem:[#allocation4 + $0x1]] %s110_s19 }
 0x128   :  { %160 = shalt.err (!%p157_p2)
}
 0x129   :  { %s164_s27 = smov [#allocation4]  }
 0x12a   :  { %123 = dma.smem_to_hbm %s164_s27, 16, %s207_s2, [#allocation5]  }
 0x12b   :  { %161 = dma.done.wait [#allocation5], 16  }
 0x12c   :  { %162 = vsyncadd [#allocation5], 4294967280 }
 0x12d   :  { %127 = sfence }
 0x12e   :  { %128 = vsyncpa [#allocation5], 1 }

</bundles_post_ra>
